<compile_context>
chip_gen: v7x
topology: tpu7x:2x2x1
jax: 0.10.0
libtpu: 0.0.40
codegen_flags: <defaults>
</compile_context>

<pallas_src>
import functools

import jax
import jax.numpy as jnp
from jax.experimental import pallas as pl
from jax.experimental.pallas import tpu as pltpu


def ae1_kernel(x_ref, w1_ref, b1_ref, w2_ref, b2_ref, o_ref):
    """sigmoid(relu(x @ W1 + b1) @ W2 + b2) for one batch tile."""
    b1 = b1_ref[...]                       # (1, H)     f32
    b2 = b2_ref[...]                       # (1, D_out) f32

    # Cast the activation tile to the MXU input dtype in VMEM (no HBM pass),
    # accumulate in f32 on the MXU.
    x = x_ref[...].astype(w1_ref.dtype)
    h = jnp.dot(x, w1_ref[...], preferred_element_type=jnp.float32)
    h = jnp.maximum(h + b1, 0.0)           # f32 epilogue on the VPU

    y = jnp.dot(h.astype(w2_ref.dtype), w2_ref[...],
                preferred_element_type=jnp.float32)
    o_ref[...] = jax.nn.sigmoid(y + b2).astype(o_ref.dtype)


def _round_up(n, m):
    return ((n + m - 1) // m) * m


def _vmem_budget_bytes():
    """(buffer budget, compiler vmem limit) derived from physical VMEM."""
    try:
        cap = pltpu.get_tpu_info().vmem_capacity_bytes
    except Exception:
        cap = 64 * 1024 * 1024             # conservative fallback: v7x per-TC
    return int(0.70 * cap), int(0.75 * cap)


def prepare_ae1_params(w1, b1, w2, b2, matmul_dtype=jnp.bfloat16):
    """One-time parameter prep: transpose to [in, out], cast, reshape biases.

    Hoisted out of the per-call path so steady-state forward traffic is only
    the x / out streams.
    """
    w1_t = jnp.asarray(w1).T.astype(matmul_dtype)            # (D_in, H)
    w2_t = jnp.asarray(w2).T.astype(matmul_dtype)            # (H, D_out)
    b1_r = jnp.asarray(b1).astype(jnp.float32).reshape(1, -1)  # (1, H)
    b2_r = jnp.asarray(b2).astype(jnp.float32).reshape(1, -1)  # (1, D_out)
    return w1_t, b1_r, w2_t, b2_r


@functools.partial(jax.jit, static_argnames=("block_b",))
def ae1_apply(x, w1_t, b1_r, w2_t, b2_r, *, block_b=512):
    B, D_in = x.shape
    H = w1_t.shape[1]
    D_out = w2_t.shape[1]

    x_bytes = jnp.dtype(x.dtype).itemsize
    w_bytes = jnp.dtype(w1_t.dtype).itemsize
    out_bytes = x_bytes

    budget, vmem_limit = _vmem_budget_bytes()

    def tile_bytes(tb):
        # Double-buffered x / out tiles.
        tiles = 2 * tb * (D_in * x_bytes + D_out * out_bytes)
        # Weights/biases are double-buffered by Pallas even with constant
        # index_maps.
        weights = 2 * ((D_in * H + H * D_out) * w_bytes + (H + D_out) * 4)
        # In-kernel f32 intermediates (h, relu/cast, y, sigmoid).
        interm = tb * (2 * H + 2 * D_out) * 4
        return tiles + weights + interm

    # ---- batch tile selection ----------------------------------------------
    TB = min(block_b, B)
    if TB < B:
        TB = min(_round_up(TB, 8), B)

    # Grow on big-VMEM chips (v5e/v6e: 128 MiB) to amortize grid-step overhead
    while True:
        nxt = min(TB * 2, B, 2048)
        if nxt <= TB or tile_bytes(nxt) > budget:
            break
        TB = nxt
    # Shrink if the tile does not fit (hits v7x's 64 MiB first).
    while TB > 8 and tile_bytes(TB) > budget:
        TB = min(max(8, _round_up(TB // 2, 8)), B)

    # Guarantee >= 2 grid steps when possible so the "parallel" batch axis can
    # actually be sharded across both TensorCores on v7x (cheap elsewhere).
    if pl.cdiv(B, TB) < 2 and TB > 8 and B > 8:
        TB = min(max(8, _round_up(pl.cdiv(TB, 2), 8)), B)

    grid = (pl.cdiv(B, TB),)

    # Feature axes use full-array block dims (valid even when < 128).  The
    # partial last batch block is handled by Pallas (masked stores), so there
    # is no wrapper-side padding pass and no post-kernel slice.
    # TODO(synk): for configurations where the resident weights no longer fit
    # the VMEM budget, add a K-reduction grid axis over D_in with an f32 VMEM
    # accumulator ("arbitrary" axis) instead of whole-weight residency.
    return pl.pallas_call(
        ae1_kernel,
        out_shape=jax.ShapeDtypeStruct((B, D_out), x.dtype),
        grid_spec=pl.GridSpec(
            grid=grid,
            in_specs=[
                pl.BlockSpec((TB, D_in), lambda i: (i, 0)),   # x follows batch
                pl.BlockSpec((D_in, H), lambda i: (0, 0)),    # resident W1
                pl.BlockSpec((1, H), lambda i: (0, 0)),       # resident b1
                pl.BlockSpec((H, D_out), lambda i: (0, 0)),   # resident W2
                pl.BlockSpec((1, D_out), lambda i: (0, 0)),   # resident b2
            ],
            out_specs=pl.BlockSpec((TB, D_out), lambda i: (i, 0)),
        ),
        compiler_params=pltpu.CompilerParams(
            dimension_semantics=("parallel",),                # megacore-shardable
            vmem_limit_bytes=vmem_limit,
        ),
    )(x, w1_t, b1_r, w2_t, b2_r)


def ae1_forward(x, w1, b1, w2, b2, *, block_b=512, matmul_dtype=jnp.bfloat16):
    """AE1 forward with PyTorch nn.Linear parameter layout.

    x : [B, D_in]; w1: [H, D_in], b1: [H]; w2: [D_out, H], b2: [D_out].
    Convenience wrapper; for repeated calls, run prepare_ae1_params once and
    call ae1_apply directly.
    """
    params = prepare_ae1_params(w1, b1, w2, b2, matmul_dtype)
    return ae1_apply(x, *params, block_b=block_b)


# TODO(synk): training-side pieces of AE1 (Adadelta optimizer, BCE loss) are
# not part of the forward pass and are intentionally not implemented here.


def reference_forward(x, w1, b1, w2, b2):
    h = jnp.maximum(x @ w1.T + b1, 0.0)
    return jax.nn.sigmoid(h @ w2.T + b2)


def _make_params(key, D_in, H, D_out):
    k1, kb1, k2, kb2 = jax.random.split(key, 4)
    bound1 = 1.0 / (D_in ** 0.5)
    w1 = jax.random.uniform(k1, (H, D_in), minval=-bound1, maxval=bound1,
                            dtype=jnp.float32)
    b1 = jax.random.uniform(kb1, (H,), minval=-bound1, maxval=bound1,
                            dtype=jnp.float32)
    bound2 = 1.0 / (H ** 0.5)
    w2 = jax.random.uniform(k2, (D_out, H), minval=-bound2, maxval=bound2,
                            dtype=jnp.float32)
    b2 = jax.random.uniform(kb2, (D_out,), minval=-bound2, maxval=bound2,
                            dtype=jnp.float32)
    return w1, b1, w2, b2


if __name__ == "__main__":
    key = jax.random.PRNGKey(0)
    kx1, kp1, kx2, kp2 = jax.random.split(key, 4)

    # --- config 1: small shapes consistent with AE1(D_in, H, D_out) ---------
    B, D_in, H, D_out = 8, 64, 32, 64
    x = jax.random.normal(kx1, (B, D_in), dtype=jnp.float32)
    w1, b1, w2, b2 = _make_params(kp1, D_in, H, D_out)
    ref = reference_forward(x, w1, b1, w2, b2)

    # Default bf16 MXU path (f32 accumulation + epilogue): relaxed tolerance.
    out_bf16 = jax.block_until_ready(ae1_forward(x, w1, b1, w2, b2))
    assert out_bf16.shape == (B, D_out)
    assert jnp.allclose(out_bf16.astype(jnp.float32), ref,
                        atol=2e-2, rtol=2e-2), "bf16 path mismatch"

    # f32 MXU path: tight tolerance against the PyTorch-convention reference.
    out_f32 = jax.block_until_ready(
        ae1_forward(x, w1, b1, w2, b2, matmul_dtype=jnp.float32))
    assert out_f32.shape == (B, D_out)
    assert jnp.allclose(out_f32, ref, atol=1e-5, rtol=1e-5), "f32 path mismatch"

    # --- config 2: ragged batch / narrow features -> partial block + 2-step
    # grid (exercises masked stores and the megacore split path) -------------
    B2, D_in2, H2, D_out2 = 100, 48, 32, 40
    x2 = jax.random.normal(kx2, (B2, D_in2), dtype=jnp.float32)
    w1b, b1b, w2b, b2b = _make_params(kp2, D_in2, H2, D_out2)
    ref2 = reference_forward(x2, w1b, b1b, w2b, b2b)

    out2 = jax.block_until_ready(ae1_forward(x2, w1b, b1b, w2b, b2b))
    assert out2.shape == (B2, D_out2)
    assert jnp.allclose(out2.astype(jnp.float32), ref2,
                        atol=2e-2, rtol=2e-2), "ragged bf16 path mismatch"

    print("KERNEL_OK")
</pallas_src>

<mosaic_0001>
module attributes {stable_mosaic.version = 11 : i64} {
  func.func @ae1_kernel(%arg0: i32, %arg1: memref<8x64xf32, #tpu.memory_space<vmem>>, %arg2: memref<64x32xbf16, #tpu.memory_space<vmem>>, %arg3: memref<1x32xf32, #tpu.memory_space<vmem>>, %arg4: memref<32x64xbf16, #tpu.memory_space<vmem>>, %arg5: memref<1x64xf32, #tpu.memory_space<vmem>>, %arg6: memref<8x64xf32, #tpu.memory_space<vmem>>) attributes {dimension_semantics = [#tpu.dimension_semantics<parallel>], iteration_bounds = array<i64: 1>, scalar_prefetch = 0 : i64, scratch_operands = 0 : i64, tpu.core_type = #tpu.core_type<tc>, window_params = [{transform_indices = @transform_0, window_bounds = array<i64: 8, 64>}, {pipeline_mode = #tpu.pipeline_mode<synchronous>, transform_indices = @transform_1, window_bounds = array<i64: 64, 32>}, {pipeline_mode = #tpu.pipeline_mode<synchronous>, transform_indices = @transform_2, window_bounds = array<i64: 1, 32>}, {pipeline_mode = #tpu.pipeline_mode<synchronous>, transform_indices = @transform_3, window_bounds = array<i64: 32, 64>}, {pipeline_mode = #tpu.pipeline_mode<synchronous>, transform_indices = @transform_4, window_bounds = array<i64: 1, 64>}, {transform_indices = @transform_5, window_bounds = array<i64: 8, 64>}]} {
    %c0 = arith.constant 0 : index
    %c0_0 = arith.constant 0 : index
    %0 = vector.load %arg3[%c0, %c0_0] : memref<1x32xf32, #tpu.memory_space<vmem>>, vector<1x32xf32>
    %c0_1 = arith.constant 0 : index
    %c0_2 = arith.constant 0 : index
    %1 = vector.load %arg5[%c0_1, %c0_2] : memref<1x64xf32, #tpu.memory_space<vmem>>, vector<1x64xf32>
    %c0_3 = arith.constant 0 : index
    %c0_4 = arith.constant 0 : index
    %2 = vector.load %arg1[%c0_3, %c0_4] : memref<8x64xf32, #tpu.memory_space<vmem>>, vector<8x64xf32>
    %3 = arith.truncf %2 : vector<8x64xf32> to vector<8x64xbf16>
    %c0_5 = arith.constant 0 : index
    %c0_6 = arith.constant 0 : index
    %4 = vector.load %arg2[%c0_5, %c0_6] : memref<64x32xbf16, #tpu.memory_space<vmem>>, vector<64x32xbf16>
    %cst = arith.constant dense<0.000000e+00> : vector<8x32xf32>
    %5 = tpu.matmul %3, %4, %cst {dimension_numbers = #tpu.dot_dimension_numbers<[1], [0], [0], [1], [0, 0, 1, 1], [], []>} : vector<8x64xbf16>, vector<64x32xbf16>, vector<8x32xf32> -> vector<8x32xf32>
    %6 = vector.broadcast %0 : vector<1x32xf32> to vector<8x32xf32>
    %7 = arith.addf %5, %6 : vector<8x32xf32>
    %cst_7 = arith.constant 0.000000e+00 : f32
    %8 = vector.broadcast %cst_7 : f32 to vector<8x32xf32>
    %9 = arith.maximumf %7, %8 : vector<8x32xf32>
    %10 = arith.truncf %9 : vector<8x32xf32> to vector<8x32xbf16>
    %c0_8 = arith.constant 0 : index
    %c0_9 = arith.constant 0 : index
    %11 = vector.load %arg4[%c0_8, %c0_9] : memref<32x64xbf16, #tpu.memory_space<vmem>>, vector<32x64xbf16>
    %cst_10 = arith.constant dense<0.000000e+00> : vector<8x64xf32>
    %12 = tpu.matmul %10, %11, %cst_10 {dimension_numbers = #tpu.dot_dimension_numbers<[1], [0], [0], [1], [0, 0, 1, 1], [], []>} : vector<8x32xbf16>, vector<32x64xbf16>, vector<8x64xf32> -> vector<8x64xf32>
    %13 = vector.broadcast %1 : vector<1x64xf32> to vector<8x64xf32>
    %14 = arith.addf %12, %13 : vector<8x64xf32>
    %15 = arith.negf %14 : vector<8x64xf32>
    %16 = math.exp %15 : vector<8x64xf32>
    %cst_11 = arith.constant 1.000000e+00 : f32
    %17 = vector.broadcast %cst_11 : f32 to vector<8x64xf32>
    %18 = arith.addf %17, %16 : vector<8x64xf32>
    %19 = arith.divf %17, %18 : vector<8x64xf32>
    %c0_12 = arith.constant 0 : index
    %c0_13 = arith.constant 0 : index
    %20 = vector.load %arg6[%c0_12, %c0_13] : memref<8x64xf32, #tpu.memory_space<vmem>>, vector<8x64xf32>
    tpu.vector_store %arg6[%c0_12, %c0_13], %19 {strides = array<i32>} : memref<8x64xf32, #tpu.memory_space<vmem>>, vector<8x64xf32>,
    return
  }
  func.func @transform_0(%arg0: i32) -> (i32, i32) {
    %c0_i32 = arith.constant 0 : i32
    %c0_i32_0 = arith.constant 0 : i32
    return %arg0, %c0_i32 : i32, i32
  }
  func.func @transform_1(%arg0: i32) -> (i32, i32) {
    %c0_i32 = arith.constant 0 : i32
    %c0_i32_0 = arith.constant 0 : i32
    %c0_i32_1 = arith.constant 0 : i32
    return %c0_i32, %c0_i32_0 : i32, i32
  }
  func.func @transform_2(%arg0: i32) -> (i32, i32) {
    %c0_i32 = arith.constant 0 : i32
    %c0_i32_0 = arith.constant 0 : i32
    %c0_i32_1 = arith.constant 0 : i32
    return %c0_i32, %c0_i32_0 : i32, i32
  }
  func.func @transform_3(%arg0: i32) -> (i32, i32) {
    %c0_i32 = arith.constant 0 : i32
    %c0_i32_0 = arith.constant 0 : i32
    %c0_i32_1 = arith.constant 0 : i32
    return %c0_i32, %c0_i32_0 : i32, i32
  }
  func.func @transform_4(%arg0: i32) -> (i32, i32) {
    %c0_i32 = arith.constant 0 : i32
    %c0_i32_0 = arith.constant 0 : i32
    %c0_i32_1 = arith.constant 0 : i32
    return %c0_i32, %c0_i32_0 : i32, i32
  }
  func.func @transform_5(%arg0: i32) -> (i32, i32) {
    %c0_i32 = arith.constant 0 : i32
    %c0_i32_0 = arith.constant 0 : i32
    return %arg0, %c0_i32 : i32, i32
  }
}

</mosaic_0001>

<bundles_post_ra>
// kernel: ae1_apply.1
= control target key start
LH: loop header
LB: loop body
LE: loop exit
PB: predicated region body
PF: predicated region fallthrough
CT: control target
= control target key end

     0   :  { %v273_v1 = vmov 0.0   ;;  %vm274_vm0 = vmmov 0   ;;  %s347_s0 = inlined_call_operand.vmem [shape: f32[8,64], index: 0, kind: input, shape index: {}]   ;;  %s348_s1 = inlined_call_operand.vmem [shape: bf16[64,32], index: 1, kind: input, shape index: {}]   ;;  %s349_s2 = inlined_call_operand.vmem [shape: f32[1,32], index: 2, kind: input, shape index: {}]   ;;  %s350_s3 = inlined_call_operand.vmem [shape: bf16[32,64], index: 3, kind: input, shape index: {}]   ;;  %s351_s4 = inlined_call_operand.vmem [shape: f32[1,64], index: 4, kind: input, shape index: {}]   ;;  %s352_s5 = inlined_call_operand.hbm [shape: f32[8,64], index: 5, kind: output, shape index: {}]  }
   0x1   :  { %v239_v0 = vld [vmem:[%s348_s1] sm:$0xff]   ;;  %216 = vmatprep.subr.bf16.mxu0 %v273_v1  ;;  %228 = vmatprep.subr.bf16.mxu1 %v273_v1  ;;  %v240_v2 = vld [vmem:[%s348_s1 + $0x8] sm:$0xff]   ;;  %v241_v3 = vld [vmem:[%s348_s1 + $0x10] sm:$0xff]  }
   0x2   :  { %217 = vmatpush3.bf16.msra.mxu0 %v239_v0  ;;  %224 = vmatprep.mubr.msk.bf16.mxu0 %vm274_vm0, %v273_v1 }
   0x3   :  { %218 = vmatprep.subr.bf16.mxu0 %v273_v1  ;;  %232 = vmatprep.mubr.msk.bf16.mxu1 %vm274_vm0, %v273_v1 }
   0x6   :  { %219 = vmatpush3.bf16.msra.mxu0 %v240_v2 }
   0x7   :  { %10 = vsyncpa [#allocation3], 0  ;;  %220 = vmatprep.subr.bf16.mxu0 %v273_v1  ;;  %v242_v4 = vld [vmem:[%s348_s1 + $0x18] sm:$0xff]   ;;  %v24_v5 = vld [vmem:[%s347_s0] sm:$0xff]  ;;  %vm64_vm1 = vcmask 523264   ;;  %vm132_vm2 = vcmask 261120  }
   0x8   :  { %v25_v6 = vpack.c.bf16 %v24_v5, %v24_v5  ;;  %v243_v7 = vld [vmem:[%s350_s3] sm:$0xff]   ;;  %v244_v8 = vld [vmem:[%s350_s3 + $0x8] sm:$0xff]  }
   0x9   :  { %229 = vmatpush3.bf16.msra.mxu1 %v243_v7  ;;  %v197_v9 = vld [vmem:[%s349_s2] ss:$0 sm:$0xff]  ;;  %s275_s2 = smov [#allocation2]  }
   0xa   :  { %221 = vmatpush3.bf16.msra.mxu0 %v241_v3  ;;  %230 = vmatprep.subr.bf16.mxu1 %v273_v1  ;;  %v203_v17 = vld [vmem:[%s351_s4] ss:$0 sm:$0xff]  ;;  %s189_s3 = sshll.u32 %s275_s2, 4  ;;  %s190_s3 = int_to_ptr.vmem [resolvable:$true] %s189_s3 }
   0xb   :  { %222 = vmatprep.subr.bf16.mxu0 %v273_v1  ;;  %s249_s9 = scalar_lea.vmem %s190_s3, 128  ;;  %p254_p1 = scmp.lt.s32.totalorder %s190_s3, %s190_s3 }
   0xc   :  { %p250_p0 = scmp.ne.s32.totalorder %s190_s3, %s249_s9  ;;  %p255_p2 = scmp.lt.s32.totalorder %s249_s9, %s249_s9 }
   0xd   :  { %231 = vmatpush3.bf16.msra.mxu1 %v244_v8 }
   0xe   :  { %223 = vmatpush3.bf16.msra.mxu0 %v242_v4  ;;  %p256_p3 = por %p255_p2, %p254_p1 }
  0x10   :  { %p257_p4 = pnand %p256_p3, %p250_p0 }
  0x11   :  { %225 = vmatmul.mubr.msk.bf16.vlgmr.msra.gmra.mrb[0].mxu0 %vm64_vm1, %v25_v6 }
  0xe4   :  { %v102_v10 = vpop.f32.mrb[0].mxu0 }
  0xe5   :  { %v103_v11 = vadd.f32 %v197_v9, %v102_v10  ;;  %v226_v12 = vpop.f32.mrb[1].mxu0 }
  0xe6   :  { %v105_v13 = vpop.f32.mrb[2].mxu0 }
  0xe7   :  { %v108_v14 = vmax.f32 %v103_v11, 0.0  ;;  %v227_v15 = vpop.f32.mrb[3].mxu0 }
  0xe9   :  { %v109_v16 = vpack.c.bf16 %v108_v14, %v108_v14 }
  0xeb   :  { %233 = vmatmul.mubr.msk.bf16.vlgmr.msra.gmra.mrb[0].mxu1 %vm132_vm2, %v109_v16 }
 0x1be   :  { %v170_v18 = vpop.f32.mrb[0].mxu1 }
 0x1bf   :  { %v171_v19 = vadd.f32 %v203_v17, %v170_v18  ;;  %v234_v20 = vpop.f32.mrb[1].mxu1 }
 0x1c0   :  { %v173_v21 = vpop.f32.mrb[2].mxu1 }
 0x1c1   :  { %v207_v22 = vmul.f32 -1.442695, %v171_v19  ;;  %v235_v23 = vpop.f32.mrb[3].mxu1 }
 0x1c3   :  { %245 = vpow2.f32 %v207_v22 }
 0x1cd   :  { %v246_v24 = vpop.eup %245 }
 0x1ce   :  { %v179_v25 = vadd.f32 1.0, %v246_v24 }
 0x1d0   :  { %247 = vrcp.f32 %v179_v25 }
 0x1da   :  { %v248_v26 = vpop.eup %247 }
 0x1db   :  { %182 = vst.msk [vmem:[#allocation2] sm:$0xff] %vm64_vm1, %v248_v26 }
 0x1dc   :  { %260 = shalt.err (!%p257_p4)
}
 0x1dd   :  { %s261_s11 = scalar_lea.hbm %s352_s5, 128 }
 0x1de   :  { %p262_p5 = scmp.ne.s32.totalorder %s352_s5, %s261_s11  ;;  %p265_p6 = scmp.lt.u32.totalorder %s261_s11, %s352_s5 }
 0x1e0   :  { %p267_p7 = pnand %p265_p6, %p262_p5 }
 0x1e2   :  { %270 = shalt.err (!%p267_p7)
}
 0x1e3   :  { %192 = dma.vmem_to_hbm [thread:$0]  %s190_s3, 128, %s352_s5, [#allocation3]  }
 0x1e4   :  { %271 = dma.done.wait [#allocation3], 128  }
 0x1e5   :  { %272 = vsyncadd [#allocation3], 4294967168 }
 0x1e6   :  { %196 = vsyncpa [#allocation3], 1 }

</bundles_post_ra>
